<compile_context>
chip_gen: v5e
topology: v5e:2x2
jax: 0.10.0
libtpu: 0.0.40
codegen_flags: <defaults>
</compile_context>

<pallas_src>
from functools import partial

import jax
import jax.numpy as jnp
from jax.experimental import pallas as pl
from jax.experimental.pallas import tpu as pltpu


def _round_up(x, m):
    return ((x + m - 1) // m) * m


def _vmem_capacity_bytes():
    try:
        return int(pltpu.get_tpu_info().vmem_capacity_bytes)
    except Exception:
        return 64 * 1024 * 1024  # conservative fallback (v7x per-TensorCore VMEM)


def _invariant_spec(block_shape):
    """BlockSpec for a grid-invariant input; request single-buffering when available."""
    index_map = lambda b, lt: (0,) * len(block_shape)
    try:
        return pl.BlockSpec(block_shape, index_map, pipeline_mode=pl.Buffered(1))
    except Exception:  # older jax without pipeline_mode / Buffered
        return pl.BlockSpec(block_shape, index_map)


# ---------------------------------------------------------------------------
# Fused mix-prop + 1x1-conv MLP kernel.  Grid = (B, L-tiles), both "parallel".
#   h_0 = x ; h_i = (1-alpha)*x + h_{i-1} @ (alpha * A_norm)
#   y   = W @ concat_i(h_i) + bias
# Kernel-internal layout: rows = (l-major, channel-minor), lanes = node (padded
# to a multiple of 128).  All matmuls are strictly 2-D with f32 accumulation.
# ---------------------------------------------------------------------------
def _mixgcn_kernel(a_ref, x_ref, w_ref, b_ref, o_ref, *,
                   gdep, alpha, c_in_p, tile_l, compute_dtype):
    cdt = compute_dtype
    f32 = jnp.float32

    def mm(lhs, rhs):  # plain (M,K)@(K,N) MXU matmul, f32 accumulation
        return jax.lax.dot_general(lhs, rhs, (((1,), (0,)), ((), ())),
                                   preferred_element_type=f32)

    a = a_ref[...]            # (Np, Np)        compute dtype, alpha pre-folded
    w = w_ref[...]            # (C_out_p, K_p)  compute dtype
    bvec = b_ref[...]         # (C_out_p, 1)    float32
    x2 = x_ref[0, 0]          # (tile_l*C_in_p, Np), rows are (l, c) l-major

    # ---- mix-prop recurrence -------------------------------------------------
    x_c = x2.astype(cdt)
    hs = [x_c]                                  # hop states (compute dtype), kept live
    if gdep > 0:
        xm = (1.0 - alpha) * x2.astype(f32)     # hoisted loop-invariant VPU work
        h_c = x_c
        for _ in range(gdep):
            hp = mm(h_c, a)                     # (tile_l*C_in_p, Np), f32 accumulation
            h_c = (xm + hp).astype(cdt)         # single cast per hop, reused twice
            hs.append(h_c)

    # ---- 1x1-conv MLP: one fused-K 2-D matmul per L row ----------------------
    parts = []
    for l in range(tile_l):
        r0 = l * c_in_p
        hcat_l = jnp.concatenate([h[r0:r0 + c_in_p, :] for h in hs], axis=0)  # (K_p, Np)
        parts.append(mm(w, hcat_l) + bvec)      # (C_out_p, Np), f32
    y = jnp.concatenate(parts, axis=0)          # (tile_l*C_out_p, Np), rows = (l, o)
    o_ref[0, 0] = y.astype(o_ref.dtype)


@partial(jax.jit, static_argnames=("gdep", "alpha", "use_bf16", "tile_l"))
def mixgcn_forward(x, adj, w, bias, *, gdep, alpha, use_bf16=True, tile_l=None):
    B, C_in, N, L = x.shape
    C_out, K = w.shape
    assert K == (gdep + 1) * C_in
    assert adj.shape == (N, N)

    cdt = jnp.bfloat16 if use_bf16 else jnp.float32
    cb = 2 if use_bf16 else 4

    # padded sizes: node dim on lanes (mult of 128); channel blocks padded to 8 rows
    n_pad = _round_up(N, 128)
    c_in_p = _round_up(C_in, 8)
    c_out_p = _round_up(C_out, 8)
    k_p = (gdep + 1) * c_in_p
    l_ru8 = _round_up(L, 8)

    # ---- generation-aware VMEM budget (adjacency / weights / states included) ----
    vmem_cap = _vmem_capacity_bytes()
    tile_budget = int(vmem_cap * 0.60)
    invariant = 2 * (n_pad * n_pad * cb + c_out_p * k_p * cb + c_out_p * 4)
    per_l = n_pad * (2 * c_in_p * cb              # x tile, double-buffered
                     + 2 * c_out_p * cb           # out tile, double-buffered
                     + (gdep + 1) * c_in_p * cb   # live hop states
                     + 3 * c_in_p * 4             # xm / hp / sum f32 temporaries
                     + c_out_p * 4)               # MLP f32 rows
    if tile_l is None:
        avail = max(tile_budget - invariant, 0)
        tile_l = (avail // max(per_l, 1)) // 8 * 8
        tile_l = int(min(32, max(8, tile_l)))     # in-kernel l loop is unrolled: keep modest
    tile_l = max(8, (min(int(tile_l), l_ru8) // 8) * 8)
    # v7x megacore: keep >= 2 grid steps so both TensorCores get work when B == 1
    if B == 1 and tile_l >= l_ru8 and l_ru8 > 8:
        tile_l = _round_up(l_ru8 // 2, 8)
    l_pad = _round_up(L, tile_l)
    num_l = l_pad // tile_l

    est = invariant + per_l * tile_l + (4 << 20)
    vmem_limit = int(min(max(int(vmem_cap * 0.75), est), int(vmem_cap * 0.92)))

    # ---- adjacency normalization (one-off (N,N) op in plain JAX), alpha folded in ----
    eye = jnp.eye(N, dtype=adj.dtype)
    adj1 = jnp.where(adj != 0, jnp.ones_like(adj), adj) + eye
    d = jnp.sum(adj1, axis=1, keepdims=True)
    a = (alpha * (adj + eye)) / d
    a_p = jnp.pad(a, ((0, n_pad - N), (0, n_pad - N))).astype(cdt)

    # ---- mlp weight / bias in the padded (hop, channel) layout ----
    w3 = w.reshape(C_out, gdep + 1, C_in)
    w3 = jnp.pad(w3, ((0, c_out_p - C_out), (0, 0), (0, c_in_p - C_in)))
    w_p = w3.reshape(c_out_p, k_p).astype(cdt)
    b_p = jnp.pad(bias, (0, c_out_p - C_out)).reshape(c_out_p, 1).astype(jnp.float32)

    # ---- lane-dense input layout: rows = (l, c) l-major, lanes = node ----
    x_p = jnp.pad(x, ((0, 0), (0, c_in_p - C_in), (0, 0), (0, 0)))
    x_t = jnp.transpose(x_p, (0, 1, 3, 2))                              # (B, C_in_p, L, N)
    x_t = jnp.pad(x_t, ((0, 0), (0, 0), (0, l_pad - L), (0, n_pad - N)))
    x_r = x_t.reshape(B, c_in_p, num_l, tile_l, n_pad)
    x_r = jnp.transpose(x_r, (0, 2, 3, 1, 4)).reshape(B, num_l, tile_l * c_in_p, n_pad)
    x_r = x_r.astype(cdt)      # bf16 feed halves x HBM read + VMEM when use_bf16

    out_dtype = jnp.bfloat16 if use_bf16 else jnp.float32
    kernel = partial(_mixgcn_kernel, gdep=gdep, alpha=alpha, c_in_p=c_in_p,
                     tile_l=tile_l, compute_dtype=cdt)
    out = pl.pallas_call(
        kernel,
        out_shape=jax.ShapeDtypeStruct((B, num_l, tile_l * c_out_p, n_pad), out_dtype),
        grid_spec=pltpu.PrefetchScalarGridSpec(
            num_scalar_prefetch=0,
            grid=(B, num_l),
            in_specs=[
                _invariant_spec((n_pad, n_pad)),                         # adjacency
                pl.BlockSpec((1, 1, tile_l * c_in_p, n_pad),
                             lambda b, lt: (b, lt, 0, 0)),               # x tile
                _invariant_spec((c_out_p, k_p)),                         # mlp weight
                _invariant_spec((c_out_p, 1)),                           # mlp bias
            ],
            out_specs=pl.BlockSpec((1, 1, tile_l * c_out_p, n_pad),
                                   lambda b, lt: (b, lt, 0, 0)),
        ),
        compiler_params=pltpu.CompilerParams(
            dimension_semantics=("parallel", "parallel"),
            vmem_limit_bytes=vmem_limit,
        ),
    )(a_p, x_r, w_p, b_p)

    # ---- strip padding, back to the PyTorch (B, C_out, N, L) layout ----
    y5 = out.reshape(B, num_l, tile_l, c_out_p, n_pad)[:, :, :, :C_out, :N]
    y = jnp.transpose(y5, (0, 3, 4, 1, 2)).reshape(B, C_out, N, l_pad)[:, :, :, :L]
    return y.astype(x.dtype)


# ---------------------------------------------------------------------------
# Plain-JAX reference (mirrors the PyTorch forward exactly)
# ---------------------------------------------------------------------------
def mixgcn_reference(x, adj, w, bias, *, gdep, alpha):
    n = adj.shape[0]
    eye = jnp.eye(n, dtype=adj.dtype)
    adj1 = jnp.where(adj != 0, jnp.ones_like(adj), adj) + eye
    adjp = adj + eye
    d = adj1.sum(1)
    a = adjp / d[:, None]
    h = x
    out = [x]
    for _ in range(gdep):
        h = (1.0 - alpha) * x + alpha * jnp.einsum('bcnl,nw->bcwl', h, a)
        out.append(h)
    ho = jnp.concatenate(out, axis=1)
    y = jnp.einsum('ok,bknl->bonl', w, ho) + bias[None, :, None, None]
    return y


if __name__ == "__main__":
    # small shapes consistent with the module
    B, C_in, N, L = 2, 4, 16, 8
    gdep, alpha, C_out = 2, 0.05, 8

    key = jax.random.PRNGKey(0)
    kx, kadj, kw, kb = jax.random.split(key, 4)

    x = jax.random.normal(kx, (B, C_in, N, L), dtype=jnp.float32)
    # adjacency with real zeros (exercises the torch.where branch)
    u = jax.random.uniform(kadj, (N, N), dtype=jnp.float32)
    adj = jnp.where(u > 0.5, u, jnp.zeros_like(u))

    # deterministic init of Conv2d((gdep+1)*c_in -> c_out, 1x1) parameters
    K = (gdep + 1) * C_in
    w = jax.random.normal(kw, (C_out, K), dtype=jnp.float32) * (1.0 / jnp.sqrt(K))
    bias = jax.random.normal(kb, (C_out,), dtype=jnp.float32) * 0.1

    y_ref = mixgcn_reference(x, adj, w, bias, gdep=gdep, alpha=alpha)

    # exact-path validation (f32 MXU feeds)
    y_f32 = jax.block_until_ready(
        mixgcn_forward(x, adj, w, bias, gdep=gdep, alpha=alpha, use_bf16=False))
    assert y_f32.shape == (B, C_out, N, L)
    assert jnp.allclose(y_f32, y_ref, rtol=1e-3, atol=1e-3), \
        f"f32 max abs err = {jnp.max(jnp.abs(y_f32 - y_ref))}"

    # default fast path: bf16 MXU feeds with f32 accumulation, loosened tolerance
    y_bf = jax.block_until_ready(
        mixgcn_forward(x, adj, w, bias, gdep=gdep, alpha=alpha))
    assert y_bf.shape == (B, C_out, N, L)
    assert jnp.allclose(y_bf, y_ref, rtol=5e-2, atol=5e-2), \
        f"bf16 max abs err = {jnp.max(jnp.abs(y_bf - y_ref))}"

    print("KERNEL_OK")
</pallas_src>

<mosaic_0001>
module attributes {stable_mosaic.version = 11 : i64} {
  func.func @_mixgcn_kernel(%arg0: i32, %arg1: i32, %arg2: memref<128x128xf32, #tpu.memory_space<vmem>>, %arg3: memref<1x1x64x128xf32, #tpu.memory_space<vmem>>, %arg4: memref<8x24xf32, #tpu.memory_space<vmem>>, %arg5: memref<8x1xf32, #tpu.memory_space<vmem>>, %arg6: memref<1x1x64x128xf32, #tpu.memory_space<vmem>>) attributes {dimension_semantics = [#tpu.dimension_semantics<parallel>, #tpu.dimension_semantics<parallel>], iteration_bounds = array<i64: 2, 1>, scalar_prefetch = 0 : i64, scratch_operands = 0 : i64, tpu.core_type = #tpu.core_type<tc>, window_params = [{pipeline_mode = #tpu.pipeline_mode<synchronous>, transform_indices = @transform_0, window_bounds = array<i64: 128, 128>}, {transform_indices = @transform_1, window_bounds = array<i64: 1, 1, 64, 128>}, {pipeline_mode = #tpu.pipeline_mode<synchronous>, transform_indices = @transform_2, window_bounds = array<i64: 8, 24>}, {pipeline_mode = #tpu.pipeline_mode<synchronous>, transform_indices = @transform_3, window_bounds = array<i64: 8, 1>}, {transform_indices = @transform_4, window_bounds = array<i64: 1, 1, 64, 128>}]} {
    %c0 = arith.constant 0 : index
    %c0_0 = arith.constant 0 : index
    %0 = vector.load %arg2[%c0, %c0_0] : memref<128x128xf32, #tpu.memory_space<vmem>>, vector<128x128xf32>
    %c0_1 = arith.constant 0 : index
    %c0_2 = arith.constant 0 : index
    %1 = vector.load %arg4[%c0_1, %c0_2] : memref<8x24xf32, #tpu.memory_space<vmem>>, vector<8x24xf32>
    %c0_3 = arith.constant 0 : index
    %c0_4 = arith.constant 0 : index
    %2 = vector.load %arg5[%c0_3, %c0_4] : memref<8x1xf32, #tpu.memory_space<vmem>>, vector<8x1xf32>
    %c0_5 = arith.constant 0 : index
    %c0_6 = arith.constant 0 : index
    %c0_7 = arith.constant 0 : index
    %c0_8 = arith.constant 0 : index
    %3 = vector.load %arg3[%c0_5, %c0_6, %c0_7, %c0_8] : memref<1x1x64x128xf32, #tpu.memory_space<vmem>>, vector<1x1x64x128xf32>
    %4 = vector.shape_cast %3 : vector<1x1x64x128xf32> to vector<64x128xf32>
    %cst = arith.constant 0.949999988 : f32
    %5 = vector.broadcast %cst : f32 to vector<64x128xf32>
    %6 = arith.mulf %5, %4 : vector<64x128xf32>
    %cst_9 = arith.constant dense<0.000000e+00> : vector<64x128xf32>
    %7 = tpu.matmul %4, %0, %cst_9 {dimension_numbers = #tpu.dot_dimension_numbers<[1], [0], [0], [1], [0, 0, 1, 1], [], []>} : vector<64x128xf32>, vector<128x128xf32>, vector<64x128xf32> -> vector<64x128xf32>
    %8 = arith.addf %6, %7 : vector<64x128xf32>
    %cst_10 = arith.constant dense<0.000000e+00> : vector<64x128xf32>
    %9 = tpu.matmul %8, %0, %cst_10 {dimension_numbers = #tpu.dot_dimension_numbers<[1], [0], [0], [1], [0, 0, 1, 1], [], []>} : vector<64x128xf32>, vector<128x128xf32>, vector<64x128xf32> -> vector<64x128xf32>
    %10 = arith.addf %6, %9 : vector<64x128xf32>
    %11 = vector.extract_strided_slice %4 {offsets = [0, 0], sizes = [8, 128], strides = [1, 1]} : vector<64x128xf32> to vector<8x128xf32>
    %12 = vector.extract_strided_slice %8 {offsets = [0, 0], sizes = [8, 128], strides = [1, 1]} : vector<64x128xf32> to vector<8x128xf32>
    %13 = vector.extract_strided_slice %10 {offsets = [0, 0], sizes = [8, 128], strides = [1, 1]} : vector<64x128xf32> to vector<8x128xf32>
    %14 = tpu.concatenate %11, %12, %13 in 0 : vector<8x128xf32>, vector<8x128xf32>, vector<8x128xf32> -> vector<24x128xf32>
    %cst_11 = arith.constant dense<0.000000e+00> : vector<8x128xf32>
    %15 = tpu.matmul %1, %14, %cst_11 {dimension_numbers = #tpu.dot_dimension_numbers<[1], [0], [0], [1], [0, 0, 1, 1], [], []>} : vector<8x24xf32>, vector<24x128xf32>, vector<8x128xf32> -> vector<8x128xf32>
    %16 = vector.broadcast %2 : vector<8x1xf32> to vector<8x128xf32>
    %17 = arith.addf %15, %16 : vector<8x128xf32>
    %18 = vector.extract_strided_slice %4 {offsets = [8, 0], sizes = [8, 128], strides = [1, 1]} : vector<64x128xf32> to vector<8x128xf32>
    %19 = vector.extract_strided_slice %8 {offsets = [8, 0], sizes = [8, 128], strides = [1, 1]} : vector<64x128xf32> to vector<8x128xf32>
    %20 = vector.extract_strided_slice %10 {offsets = [8, 0], sizes = [8, 128], strides = [1, 1]} : vector<64x128xf32> to vector<8x128xf32>
    %21 = tpu.concatenate %18, %19, %20 in 0 : vector<8x128xf32>, vector<8x128xf32>, vector<8x128xf32> -> vector<24x128xf32>
    %cst_12 = arith.constant dense<0.000000e+00> : vector<8x128xf32>
    %22 = tpu.matmul %1, %21, %cst_12 {dimension_numbers = #tpu.dot_dimension_numbers<[1], [0], [0], [1], [0, 0, 1, 1], [], []>} : vector<8x24xf32>, vector<24x128xf32>, vector<8x128xf32> -> vector<8x128xf32>
    %23 = vector.broadcast %2 : vector<8x1xf32> to vector<8x128xf32>
    %24 = arith.addf %22, %23 : vector<8x128xf32>
    %25 = vector.extract_strided_slice %4 {offsets = [16, 0], sizes = [8, 128], strides = [1, 1]} : vector<64x128xf32> to vector<8x128xf32>
    %26 = vector.extract_strided_slice %8 {offsets = [16, 0], sizes = [8, 128], strides = [1, 1]} : vector<64x128xf32> to vector<8x128xf32>
    %27 = vector.extract_strided_slice %10 {offsets = [16, 0], sizes = [8, 128], strides = [1, 1]} : vector<64x128xf32> to vector<8x128xf32>
    %28 = tpu.concatenate %25, %26, %27 in 0 : vector<8x128xf32>, vector<8x128xf32>, vector<8x128xf32> -> vector<24x128xf32>
    %cst_13 = arith.constant dense<0.000000e+00> : vector<8x128xf32>
    %29 = tpu.matmul %1, %28, %cst_13 {dimension_numbers = #tpu.dot_dimension_numbers<[1], [0], [0], [1], [0, 0, 1, 1], [], []>} : vector<8x24xf32>, vector<24x128xf32>, vector<8x128xf32> -> vector<8x128xf32>
    %30 = vector.broadcast %2 : vector<8x1xf32> to vector<8x128xf32>
    %31 = arith.addf %29, %30 : vector<8x128xf32>
    %32 = vector.extract_strided_slice %4 {offsets = [24, 0], sizes = [8, 128], strides = [1, 1]} : vector<64x128xf32> to vector<8x128xf32>
    %33 = vector.extract_strided_slice %8 {offsets = [24, 0], sizes = [8, 128], strides = [1, 1]} : vector<64x128xf32> to vector<8x128xf32>
    %34 = vector.extract_strided_slice %10 {offsets = [24, 0], sizes = [8, 128], strides = [1, 1]} : vector<64x128xf32> to vector<8x128xf32>
    %35 = tpu.concatenate %32, %33, %34 in 0 : vector<8x128xf32>, vector<8x128xf32>, vector<8x128xf32> -> vector<24x128xf32>
    %cst_14 = arith.constant dense<0.000000e+00> : vector<8x128xf32>
    %36 = tpu.matmul %1, %35, %cst_14 {dimension_numbers = #tpu.dot_dimension_numbers<[1], [0], [0], [1], [0, 0, 1, 1], [], []>} : vector<8x24xf32>, vector<24x128xf32>, vector<8x128xf32> -> vector<8x128xf32>
    %37 = vector.broadcast %2 : vector<8x1xf32> to vector<8x128xf32>
    %38 = arith.addf %36, %37 : vector<8x128xf32>
    %39 = vector.extract_strided_slice %4 {offsets = [32, 0], sizes = [8, 128], strides = [1, 1]} : vector<64x128xf32> to vector<8x128xf32>
    %40 = vector.extract_strided_slice %8 {offsets = [32, 0], sizes = [8, 128], strides = [1, 1]} : vector<64x128xf32> to vector<8x128xf32>
    %41 = vector.extract_strided_slice %10 {offsets = [32, 0], sizes = [8, 128], strides = [1, 1]} : vector<64x128xf32> to vector<8x128xf32>
    %42 = tpu.concatenate %39, %40, %41 in 0 : vector<8x128xf32>, vector<8x128xf32>, vector<8x128xf32> -> vector<24x128xf32>
    %cst_15 = arith.constant dense<0.000000e+00> : vector<8x128xf32>
    %43 = tpu.matmul %1, %42, %cst_15 {dimension_numbers = #tpu.dot_dimension_numbers<[1], [0], [0], [1], [0, 0, 1, 1], [], []>} : vector<8x24xf32>, vector<24x128xf32>, vector<8x128xf32> -> vector<8x128xf32>
    %44 = vector.broadcast %2 : vector<8x1xf32> to vector<8x128xf32>
    %45 = arith.addf %43, %44 : vector<8x128xf32>
    %46 = vector.extract_strided_slice %4 {offsets = [40, 0], sizes = [8, 128], strides = [1, 1]} : vector<64x128xf32> to vector<8x128xf32>
    %47 = vector.extract_strided_slice %8 {offsets = [40, 0], sizes = [8, 128], strides = [1, 1]} : vector<64x128xf32> to vector<8x128xf32>
    %48 = vector.extract_strided_slice %10 {offsets = [40, 0], sizes = [8, 128], strides = [1, 1]} : vector<64x128xf32> to vector<8x128xf32>
    %49 = tpu.concatenate %46, %47, %48 in 0 : vector<8x128xf32>, vector<8x128xf32>, vector<8x128xf32> -> vector<24x128xf32>
    %cst_16 = arith.constant dense<0.000000e+00> : vector<8x128xf32>
    %50 = tpu.matmul %1, %49, %cst_16 {dimension_numbers = #tpu.dot_dimension_numbers<[1], [0], [0], [1], [0, 0, 1, 1], [], []>} : vector<8x24xf32>, vector<24x128xf32>, vector<8x128xf32> -> vector<8x128xf32>
    %51 = vector.broadcast %2 : vector<8x1xf32> to vector<8x128xf32>
    %52 = arith.addf %50, %51 : vector<8x128xf32>
    %53 = vector.extract_strided_slice %4 {offsets = [48, 0], sizes = [8, 128], strides = [1, 1]} : vector<64x128xf32> to vector<8x128xf32>
    %54 = vector.extract_strided_slice %8 {offsets = [48, 0], sizes = [8, 128], strides = [1, 1]} : vector<64x128xf32> to vector<8x128xf32>
    %55 = vector.extract_strided_slice %10 {offsets = [48, 0], sizes = [8, 128], strides = [1, 1]} : vector<64x128xf32> to vector<8x128xf32>
    %56 = tpu.concatenate %53, %54, %55 in 0 : vector<8x128xf32>, vector<8x128xf32>, vector<8x128xf32> -> vector<24x128xf32>
    %cst_17 = arith.constant dense<0.000000e+00> : vector<8x128xf32>
    %57 = tpu.matmul %1, %56, %cst_17 {dimension_numbers = #tpu.dot_dimension_numbers<[1], [0], [0], [1], [0, 0, 1, 1], [], []>} : vector<8x24xf32>, vector<24x128xf32>, vector<8x128xf32> -> vector<8x128xf32>
    %58 = vector.broadcast %2 : vector<8x1xf32> to vector<8x128xf32>
    %59 = arith.addf %57, %58 : vector<8x128xf32>
    %60 = vector.extract_strided_slice %4 {offsets = [56, 0], sizes = [8, 128], strides = [1, 1]} : vector<64x128xf32> to vector<8x128xf32>
    %61 = vector.extract_strided_slice %8 {offsets = [56, 0], sizes = [8, 128], strides = [1, 1]} : vector<64x128xf32> to vector<8x128xf32>
    %62 = vector.extract_strided_slice %10 {offsets = [56, 0], sizes = [8, 128], strides = [1, 1]} : vector<64x128xf32> to vector<8x128xf32>
    %63 = tpu.concatenate %60, %61, %62 in 0 : vector<8x128xf32>, vector<8x128xf32>, vector<8x128xf32> -> vector<24x128xf32>
    %cst_18 = arith.constant dense<0.000000e+00> : vector<8x128xf32>
    %64 = tpu.matmul %1, %63, %cst_18 {dimension_numbers = #tpu.dot_dimension_numbers<[1], [0], [0], [1], [0, 0, 1, 1], [], []>} : vector<8x24xf32>, vector<24x128xf32>, vector<8x128xf32> -> vector<8x128xf32>
    %65 = vector.broadcast %2 : vector<8x1xf32> to vector<8x128xf32>
    %66 = arith.addf %64, %65 : vector<8x128xf32>
    %67 = tpu.concatenate %17, %24, %31, %38, %45, %52, %59, %66 in 0 : vector<8x128xf32>, vector<8x128xf32>, vector<8x128xf32>, vector<8x128xf32>, vector<8x128xf32>, vector<8x128xf32>, vector<8x128xf32>, vector<8x128xf32> -> vector<64x128xf32>
    %c0_19 = arith.constant 0 : index
    %c0_20 = arith.constant 0 : index
    %c0_21 = arith.constant 0 : index
    %c0_22 = arith.constant 0 : index
    %68 = vector.load %arg6[%c0_19, %c0_20, %c0_21, %c0_22] : memref<1x1x64x128xf32, #tpu.memory_space<vmem>>, vector<1x1x64x128xf32>
    %69 = vector.shape_cast %68 : vector<1x1x64x128xf32> to vector<64x128xf32>
    %70 = vector.shape_cast %67 : vector<64x128xf32> to vector<1x1x64x128xf32>
    tpu.vector_store %arg6[%c0_19, %c0_20, %c0_21, %c0_22], %70 {strides = array<i32>} : memref<1x1x64x128xf32, #tpu.memory_space<vmem>>, vector<1x1x64x128xf32>,
    return
  }
  func.func @transform_0(%arg0: i32, %arg1: i32) -> (i32, i32) {
    %c0_i32 = arith.constant 0 : i32
    %c0_i32_0 = arith.constant 0 : i32
    %c0_i32_1 = arith.constant 0 : i32
    return %c0_i32, %c0_i32_0 : i32, i32
  }
  func.func @transform_1(%arg0: i32, %arg1: i32) -> (i32, i32, i32, i32) {
    %c0_i32 = arith.constant 0 : i32
    %c0_i32_0 = arith.constant 0 : i32
    %c0_i32_1 = arith.constant 0 : i32
    return %arg0, %arg1, %c0_i32, %c0_i32_0 : i32, i32, i32, i32
  }
  func.func @transform_2(%arg0: i32, %arg1: i32) -> (i32, i32) {
    %c0_i32 = arith.constant 0 : i32
    %c0_i32_0 = arith.constant 0 : i32
    %c0_i32_1 = arith.constant 0 : i32
    return %c0_i32, %c0_i32_0 : i32, i32
  }
  func.func @transform_3(%arg0: i32, %arg1: i32) -> (i32, i32) {
    %c0_i32 = arith.constant 0 : i32
    %c0_i32_0 = arith.constant 0 : i32
    %c0_i32_1 = arith.constant 0 : i32
    return %c0_i32, %c0_i32_0 : i32, i32
  }
  func.func @transform_4(%arg0: i32, %arg1: i32) -> (i32, i32, i32, i32) {
    %c0_i32 = arith.constant 0 : i32
    %c0_i32_0 = arith.constant 0 : i32
    %c0_i32_1 = arith.constant 0 : i32
    return %arg0, %arg1, %c0_i32, %c0_i32_0 : i32, i32, i32, i32
  }
}

</mosaic_0001>

<bundles_post_ra>
// kernel: mixgcn_forward.1
= control target key start
LH: loop header
LB: loop body
LE: loop exit
PB: predicated region body
PF: predicated region fallthrough
CT: control target
= control target key end

     0   :  { %s764_s15 = smov 0   ;;  %s766_s16 = smov 0   ;;  %s907_s0 = inlined_call_operand.vmem [shape: f32[128,128], index: 0, kind: input, shape index: {}]   ;;  %s908_s1 = inlined_call_operand.vmem [shape: f32[2,1,64,128], index: 1, kind: input, shape index: {}]   ;;  %s909_s2 = inlined_call_operand.vmem [shape: f32[8,24], index: 2, kind: input, shape index: {}]   ;;  %s910_s3 = inlined_call_operand.vmem [shape: f32[8,1], index: 3, kind: input, shape index: {}]   ;;  %s911_s4 = inlined_call_operand.vmem [shape: f32[2,1,64,128], index: 4, kind: output, shape index: {}]  }
   0x1   :  { %s768_s17 = smov 0  }
   0x2 LB: > { %s26_s18 = sadd.s32 1, %s732_s16  ;;  %p639_p0 = scmp.ge.s32.totalorder %s736_s17, 1  ;;  %s736_s17 = sphi %s768_s17, %s14_s17   ;;  %s732_s16 = sphi %s766_s16, %s913_s16   ;;  %s728_s15 = sphi %s764_s15, %s912_s15  }
   0x3   : > { %p28_p1 = scmp.ge.s32.totalorder %s26_s18, 2  ;;  %p182_p2 = scmp.lt.s32.totalorder %s736_s17, 3 }
   0x5   : > { %s915_s18 = smov (%p28_p1, %s26_s18), 0  ;;  %p183_p3 = pnand %p639_p0, %p182_p2 }
   0x6   : > { %p216_p4 = scmp.lt.s32.totalorder (!%p183_p3), %s728_s15, 1 }
   0x7   : > { %186 = sbr.rel (%p183_p3) target bundleno = 488 (0x1e8), region = 36 }
   0xc   : > { %v249_v0 = vld [vmem:[%s907_s0 + $0x78] sm:$0xff]  ;;  %v248_v1 = vld [vmem:[%s907_s0 + $0x70] sm:$0xff]  ;;  %v247_v2 = vld [vmem:[%s907_s0 + $0x68] sm:$0xff]  ;;  %s917_s15 = smov (!%p216_p4, %s728_s15), 1  ;;  %vm371_vm0 = vcmask 195584   ;;  %v738_v54 = vmov 0  }
   0xd   : > { %268 = vmatpush.msra.mxu0 %v249_v0  ;;  %656 = vmatpush.msra.mxu2 %v249_v0  ;;  %v246_v3 = vld [vmem:[%s907_s0 + $0x60] sm:$0xff]  ;;  %v245_v4 = vld [vmem:[%s907_s0 + $0x58] sm:$0xff]  ;;  %v244_v5 = vld [vmem:[%s907_s0 + $0x50] sm:$0xff]  ;;  %s654_s23 = sshll.u32 %s917_s15, 6 }
   0xe   : > { %317 = vmatpush.msra.mxu1 %v249_v0  ;;  %672 = vmatpush.msra.mxu3 %v249_v0  ;;  %v243_v6 = vld [vmem:[%s907_s0 + $0x48] sm:$0xff]  ;;  %v242_v7 = vld [vmem:[%s907_s0 + $0x40] sm:$0xff]  ;;  %v241_v8 = vld [vmem:[%s907_s0 + $0x38] sm:$0xff]  ;;  %s224_s30 = scalar_lea.vmem %s908_s1, %s654_s23  ;;  %s233_s13 = scalar_lea.vmem %s911_s4, %s654_s23 }
   0xf   : > { %269 = vmatpush.msra.mxu0 %v248_v1  ;;  %657 = vmatpush.msra.mxu2 %v248_v1  ;;  %v240_v9 = vld [vmem:[%s907_s0 + $0x30] sm:$0xff]  ;;  %v239_v10 = vld [vmem:[%s907_s0 + $0x28] sm:$0xff]  ;;  %v238_v11 = vld [vmem:[%s907_s0 + $0x20] sm:$0xff] }
  0x10   : > { %318 = vmatpush.msra.mxu1 %v248_v1  ;;  %673 = vmatpush.msra.mxu3 %v248_v1  ;;  %v237_v12 = vld [vmem:[%s907_s0 + $0x18] sm:$0xff]  ;;  %v236_v13 = vld [vmem:[%s907_s0 + $0x10] sm:$0xff]  ;;  %v235_v14 = vld [vmem:[%s907_s0 + $0x8] sm:$0xff] }
  0x11   : > { %270 = vmatpush.msra.mxu0 %v247_v2  ;;  %658 = vmatpush.msra.mxu2 %v247_v2  ;;  %v234_v15 = vld [vmem:[%s907_s0] sm:$0xff]  ;;  %v842_v17 = vld [vmem:[%s224_s30 + $0x30] sm:$0xff]  ;;  %v253_v18 = vld [vmem:[%s224_s30 + $0x8] sm:$0xff] }
  0x12   : > { %319 = vmatpush.msra.mxu1 %v247_v2  ;;  %674 = vmatpush.msra.mxu3 %v247_v2  ;;  %v252_v16 = vld [vmem:[%s224_s30] sm:$0xff]  ;;  %v845_v19 = vld [vmem:[%s224_s30 + $0x38] sm:$0xff]  ;;  %v254_v20 = vld [vmem:[%s224_s30 + $0x10] sm:$0xff]  ;;  %v266_v27 = vmul.f32 0.95, %v842_v17 }
  0x13   : > { %271 = vmatpush.msra.mxu0 %v246_v3  ;;  %659 = vmatpush.msra.mxu2 %v246_v3  ;;  %v848_v21 = vld [vmem:[%s224_s30 + $0x18] sm:$0xff]  ;;  %v851_v22 = vld [vmem:[%s224_s30 + $0x20] sm:$0xff]  ;;  %v854_v23 = vld [vmem:[%s224_s30 + $0x28] sm:$0xff]  ;;  %v260_v24 = vmul.f32 0.95, %v252_v16 }
  0x14   : > { %320 = vmatpush.msra.mxu1 %v246_v3  ;;  %675 = vmatpush.msra.mxu3 %v246_v3  ;;  %v261_v28 = vmul.f32 0.95, %v253_v18  ;;  %v862_v33 = vmul.f32 0.95, %v845_v19  ;;  %v262_v34 = vmul.f32 0.95, %v254_v20 }
  0x15   : > { %272 = vmatpush.msra.mxu0 %v245_v4  ;;  %660 = vmatpush.msra.mxu2 %v245_v4  ;;  %v263_v39 = vmul.f32 0.95, %v848_v21  ;;  %v264_v42 = vmul.f32 0.95, %v851_v22  ;;  %v265_v45 = vmul.f32 0.95, %v854_v23 }
  0x16   : > { %321 = vmatpush.msra.mxu1 %v245_v4  ;;  %676 = vmatpush.msra.mxu3 %v245_v4  ;;  %v250_v50 = vld [vmem:[%s909_s2] sm:$0xff] }
  0x17   : > { %273 = vmatpush.msra.mxu0 %v244_v5  ;;  %661 = vmatpush.msra.mxu2 %v244_v5  ;;  %v251_v56 = vld [vmem:[%s910_s3] sm:$0xff] }
  0x18   : > { %322 = vmatpush.msra.mxu1 %v244_v5  ;;  %677 = vmatpush.msra.mxu3 %v244_v5 }
  0x19   : > { %274 = vmatpush.msra.mxu0 %v243_v6  ;;  %662 = vmatpush.msra.mxu2 %v243_v6 }
  0x1a   : > { %323 = vmatpush.msra.mxu1 %v243_v6  ;;  %678 = vmatpush.msra.mxu3 %v243_v6 }
  0x1b   : > { %275 = vmatpush.msra.mxu0 %v242_v7  ;;  %663 = vmatpush.msra.mxu2 %v242_v7 }
  0x1c   : > { %324 = vmatpush.msra.mxu1 %v242_v7  ;;  %679 = vmatpush.msra.mxu3 %v242_v7 }
  0x1d   : > { %276 = vmatpush.msra.mxu0 %v241_v8  ;;  %664 = vmatpush.msra.mxu2 %v241_v8 }
  0x1e   : > { %325 = vmatpush.msra.mxu1 %v241_v8  ;;  %680 = vmatpush.msra.mxu3 %v241_v8 }
  0x1f   : > { %277 = vmatpush.msra.mxu0 %v240_v9  ;;  %665 = vmatpush.msra.mxu2 %v240_v9 }
  0x20   : > { %326 = vmatpush.msra.mxu1 %v240_v9  ;;  %681 = vmatpush.msra.mxu3 %v240_v9 }
  0x21   : > { %278 = vmatpush.msra.mxu0 %v239_v10  ;;  %666 = vmatpush.msra.mxu2 %v239_v10 }
  0x22   : > { %327 = vmatpush.msra.mxu1 %v239_v10  ;;  %682 = vmatpush.msra.mxu3 %v239_v10 }
  0x23   : > { %279 = vmatpush.msra.mxu0 %v238_v11  ;;  %667 = vmatpush.msra.mxu2 %v238_v11 }
  0x24   : > { %328 = vmatpush.msra.mxu1 %v238_v11  ;;  %683 = vmatpush.msra.mxu3 %v238_v11 }
  0x25   : > { %280 = vmatpush.msra.mxu0 %v237_v12  ;;  %668 = vmatpush.msra.mxu2 %v237_v12 }
  0x26   : > { %329 = vmatpush.msra.mxu1 %v237_v12  ;;  %684 = vmatpush.msra.mxu3 %v237_v12 }
  0x27   : > { %281 = vmatpush.msra.mxu0 %v236_v13  ;;  %669 = vmatpush.msra.mxu2 %v236_v13 }
  0x28   : > { %330 = vmatpush.msra.mxu1 %v236_v13  ;;  %685 = vmatpush.msra.mxu3 %v236_v13 }
  0x29   : > { %282 = vmatpush.msra.mxu0 %v235_v14  ;;  %670 = vmatpush.msra.mxu2 %v235_v14 }
  0x2a   : > { %331 = vmatpush.msra.mxu1 %v235_v14  ;;  %686 = vmatpush.msra.mxu3 %v235_v14 }
  0x2b   : > { %283 = vmatpush.msra.mxu0 %v234_v15  ;;  %671 = vmatpush.msra.mxu2 %v234_v15 }
  0x2c   : > { %284 = vmatmul.f32.vlgmr.msra.gmra.mxu0 %v252_v16  ;;  %302 = vmatmul.f32.vlgmr.msra.gmra.mxu2 %v842_v17 }
  0x2d   : > { %332 = vmatpush.msra.mxu1 %v234_v15  ;;  %687 = vmatpush.msra.mxu3 %v234_v15 }
  0x2e   : > { %713 = vset.pattern.permute.xlu0 %v738_v54 }
  0x2f   : > { %368 = vperm.xlu0 %713, %v251_v56  }
  0x34   : > { %287 = vmatmul.f32.gmra.mxu0 %v253_v18  ;;  %305 = vmatmul.f32.gmra.mxu2 %v845_v19 }
  0x3c   : > { %290 = vmatmul.f32.gmra.mxu0 %v254_v20 }
  0x44   : > { %293 = vmatmul.f32.gmra.mxu0 %v848_v21 }
  0x4c   : > { %296 = vmatmul.f32.gmra.mxu0 %v851_v22 }
  0x54   : > { %299 = vmatmul.f32.gmra.mxu0 %v854_v23 }
  0xa1   : > { %v369_v3 = vpop.permute.xlu0 %368 }
  0xa9   : > { %v285_v25 = vpop.f32.mrf.mxu0 }
  0xaa   : > { %v309_v26 = vadd.f32 %v285_v25, %v260_v24 }
  0xac   : > { %333 = vmatmul.f32.vlgmr.msra.gmra.mxu1 %v309_v26 }
  0xaf   : > { %v303_v29 = vpop.f32.mrf.mxu2 }
  0xb0   : > { %v858_v30 = vadd.f32 %v303_v29, %v266_v27 }
  0xb1   : > { %v288_v31 = vpop.f32.mrf.mxu0 }
  0xb2   : > { %v310_v32 = vadd.f32 %v288_v31, %v261_v28  ;;  %351 = vmatmul.f32.vlgmr.msra.gmra.mxu3 %v858_v30 }
  0xb4   : > { %336 = vmatmul.f32.gmra.mxu1 %v310_v32 }
  0xb7   : > { %v306_v35 = vpop.f32.mrf.mxu2 }
  0xb8   : > { %v865_v36 = vadd.f32 %v306_v35, %v862_v33 }
  0xb9   : > { %v291_v37 = vpop.f32.mrf.mxu0 }
  0xba   : > { %v311_v38 = vadd.f32 %v291_v37, %v262_v34  ;;  %354 = vmatmul.f32.gmra.mxu3 %v865_v36 }
  0xbc   : > { %339 = vmatmul.f32.gmra.mxu1 %v311_v38 }
  0xc1   : > { %v294_v40 = vpop.f32.mrf.mxu0 }
  0xc2   : > { %v312_v41 = vadd.f32 %v294_v40, %v263_v39 }
  0xc4   : > { %342 = vmatmul.f32.gmra.mxu1 %v312_v41 }
  0xc9   : > { %v297_v43 = vpop.f32.mrf.mxu0 }
  0xca   : > { %v313_v44 = vadd.f32 %v297_v43, %v264_v42 }
  0xcc   : > { %345 = vmatmul.f32.gmra.mxu1 %v313_v44 }
  0xd1   : > { %v300_v46 = vpop.f32.mrf.mxu0 }
  0xd2   : > { %v314_v47 = vadd.f32 %v300_v46, %v265_v45 }
  0xd4   : > { %348 = vmatmul.f32.gmra.mxu1 %v314_v47 }
 0x129   : > { %v334_v48 = vpop.f32.mrf.mxu1 }
 0x12a   : > { %v358_v49 = vadd.f32 %v334_v48, %v260_v24 }
 0x12c   : > { %388 = vmatpush.msrb.mxu2 %v358_v49 }
 0x12e   : > { %389 = vmatpush.msrb.mxu2 %v309_v26 }
 0x130   : > { %390 = vmatpush.msrb.mxu2 %v252_v16 }
 0x131   : > { %v337_v51 = vpop.f32.mrf.mxu1  ;;  %644 = vmatmul.msk.f32.vlgmr.msrb.gmra.mxu2 %vm371_vm0, %v250_v50 }
 0x132   : > { %v359_v52 = vadd.f32 %v337_v51, %v261_v28 }
 0x134   : > { %408 = vmatpush.msrb.mxu3 %v359_v52 }
 0x135   : > { %v352_v59 = vpop.f32.mrf.mxu3 }
 0x136   : > { %409 = vmatpush.msrb.mxu3 %v310_v32  ;;  %v364_v62 = vadd.f32 %v352_v59, %v266_v27 }
 0x138   : > { %410 = vmatpush.msrb.mxu3 %v253_v18 }
 0x139   : > { %v340_v53 = vpop.f32.mrf.mxu1  ;;  %645 = vmatmul.msk.f32.vlgmr.msrb.gmra.mxu3 %vm371_vm0, %v250_v50 }
 0x13a   : > { %v360_v55 = vadd.f32 %v340_v53, %v262_v34 }
 0x13c   : > { %428 = vmatpush.msra.mxu2 %v360_v55 }
 0x13d   : > { %v355_v1 = vpop.f32.mrf.mxu3 }
 0x13e   : > { %429 = vmatpush.msra.mxu2 %v311_v38  ;;  %v365_v2 = vadd.f32 %v355_v1, %v862_v33 }
 0x140   : > { %430 = vmatpush.msra.mxu2 %v254_v20 }
 0x141   : > { %v343_v57 = vpop.f32.mrf.mxu1  ;;  %646 = vmatmul.msk.f32.vlgmr.msra.gmra.mxu2 %vm371_vm0, %v250_v50 }
 0x142   : > { %v361_v58 = vadd.f32 %v343_v57, %v263_v39 }
 0x144   : > { %448 = vmatpush.msra.mxu3 %v361_v58 }
 0x146   : > { %449 = vmatpush.msra.mxu3 %v312_v41 }
 0x148   : > { %450 = vmatpush.msra.mxu3 %v848_v21 }
 0x149   : > { %v346_v60 = vpop.f32.mrf.mxu1  ;;  %647 = vmatmul.msk.f32.vlgmr.msra.gmra.mxu3 %vm371_vm0, %v250_v50 }
 0x14a   : > { %v362_v61 = vadd.f32 %v346_v60, %v264_v42 }
 0x14c   : > { %468 = vmatpush.msrb.mxu2 %v362_v61 }
 0x14e   : > { %469 = vmatpush.msrb.mxu2 %v313_v44 }
 0x150   : > { %470 = vmatpush.msrb.mxu2 %v851_v22 }
 0x151   : > { %v349_v63 = vpop.f32.mrf.mxu1  ;;  %648 = vmatmul.msk.f32.vlgmr.msrb.gmra.mxu2 %vm371_vm0, %v250_v50 }
 0x152   : > { %508 = vmatpush.msra.mxu2 %v364_v62  ;;  %v363_v0 = vadd.f32 %v349_v63, %v265_v45 }
 0x154   : > { %509 = vmatpush.msra.mxu2 %v858_v30  ;;  %488 = vmatpush.msrb.mxu3 %v363_v0 }
 0x156   : > { %510 = vmatpush.msra.mxu2 %v842_v17  ;;  %489 = vmatpush.msrb.mxu3 %v314_v47 }
 0x158   : > { %490 = vmatpush.msrb.mxu3 %v854_v23 }
 0x159   : > { %649 = vmatmul.msk.f32.vlgmr.msrb.gmra.mxu3 %vm371_vm0, %v250_v50  ;;  %650 = vmatmul.msk.f32.vlgmr.msra.gmra.mxu2 %vm371_vm0, %v250_v50 }
 0x15a   : > { %528 = vmatpush.msra.mxu3 %v365_v2 }
 0x15c   : > { %529 = vmatpush.msra.mxu3 %v865_v36 }
 0x15e   : > { %530 = vmatpush.msra.mxu3 %v845_v19 }
 0x161   : > { %651 = vmatmul.msk.f32.vlgmr.msra.gmra.mxu3 %vm371_vm0, %v250_v50 }
 0x1b4   : > { %v392_v4 = vpop.f32.mrf.mxu2 }
 0x1b5   : > { %v393_v5 = vadd.f32 %v392_v4, %v369_v3 }
 0x1b7   : > { %535 = vst [vmem:[%s233_s13] sm:$0xff] %v393_v5 }
 0x1bc   : > { %v412_v6 = vpop.f32.mrf.mxu3 }
 0x1bd   : > { %v413_v7 = vadd.f32 %v412_v6, %v369_v3 }
 0x1bf   : > { %536 = vst [vmem:[%s233_s13 + $0x8] sm:$0xff] %v413_v7 }
 0x1c4   : > { %v432_v8 = vpop.f32.mrf.mxu2 }
 0x1c5   : > { %v433_v9 = vadd.f32 %v432_v8, %v369_v3 }
 0x1c7   : > { %537 = vst [vmem:[%s233_s13 + $0x10] sm:$0xff] %v433_v9 }
 0x1cc   : > { %v452_v10 = vpop.f32.mrf.mxu3 }
 0x1cd   : > { %v453_v11 = vadd.f32 %v452_v10, %v369_v3 }
 0x1cf   : > { %538 = vst [vmem:[%s233_s13 + $0x18] sm:$0xff] %v453_v11 }
 0x1d4   : > { %v472_v12 = vpop.f32.mrf.mxu2 }
 0x1d5   : > { %v473_v13 = vadd.f32 %v472_v12, %v369_v3 }
 0x1d7   : > { %539 = vst [vmem:[%s233_s13 + $0x20] sm:$0xff] %v473_v13 }
 0x1dc   : > { %v492_v14 = vpop.f32.mrf.mxu3  ;;  %v512_v15 = vpop.f32.mrf.mxu2 }
 0x1dd   : > { %v493_v16 = vadd.f32 %v492_v14, %v369_v3  ;;  %v513_v17 = vadd.f32 %v512_v15, %v369_v3 }
 0x1df   : > { %540 = vst [vmem:[%s233_s13 + $0x28] sm:$0xff] %v493_v16 }
 0x1e0   : > { %541 = vst [vmem:[%s233_s13 + $0x30] sm:$0xff] %v513_v17 }
 0x1e4   : > { %v532_v18 = vpop.f32.mrf.mxu3 }
 0x1e5   : > { %v533_v19 = vadd.f32 %v532_v18, %v369_v3 }
 0x1e7   : > { %542 = vst [vmem:[%s233_s13 + $0x38] sm:$0xff] %v533_v19 }
 0x1e8 PF: > { %s14_s17 = sadd.s32 1, %s736_s17   ;;  %s912_s15 = smov %s732_s16 }
 0x1e9   : > { %p11_p5 = scmp.ge.s32.totalorder %s14_s17, 4   ;;  %s913_s16 = smov %s915_s18 }
 0x1eb   :  { %13 = sbr.rel (!%p11_p5) target bundleno = 2 (0x2), region = 66 }

</bundles_post_ra>
